<compile_context>
chip_gen: v7x
topology: tpu7x:2x2x1
jax: 0.10.0
libtpu: 0.0.40
codegen_flags: <defaults>
</compile_context>

<pallas_src>
import jax
import jax.numpy as jnp
from jax.experimental import pallas as pl
from jax.experimental.pallas import tpu as pltpu

LANE = 128
TB_MAX = 2048              # batch-tile cap: ~6-7 MiB double-buffered VMEM, fits all gens
MIN_GRID_STEPS = 2         # v7x: 2 TensorCores -> keep >= 2 "parallel" grid steps
SMALL_BATCH_FALLBACK = 1024  # below this, XLA beats pallas_call fixed cost


def _round_up(x, m):
    return ((x + m - 1) // m) * m


def _decoder_vector_kernel(y_ref, s_ref, w1y_ref, w1s_ref, b1_ref, w2_ref, b2_ref, o_ref):
    # Layer 1:  cat(y, s) @ W1  ==  y @ W1y + s @ W1s   (concat fused away).
    h = jnp.dot(y_ref[...], w1y_ref[...], preferred_element_type=jnp.float32)
    h = h + jnp.dot(s_ref[...], w1s_ref[...], preferred_element_type=jnp.float32)
    h = jnp.maximum(h + b1_ref[...], 0.0)                       # bias + ReLU on VPU
    # Layer 2: lane-dense hidden (128) @ W2 -> (TB, out_dim), f32 accumulation.
    out = jnp.dot(h, w2_ref[...], preferred_element_type=jnp.float32)
    o_ref[...] = (out + b2_ref[...]).astype(o_ref.dtype)


def prepare_decoder_params(w1, b1, w2, b2, *, rep_dim):
    """One-time weight prep (hoisted out of the per-call hot path).

    w1: (rep_dim + s_dim, hidden), b1: (hidden,), w2: (hidden, out_dim), b2: (out_dim,)
    Returns (w1y, w1s, b1p, w2p, b2p) with the hidden dim zero-padded to a
    lane-dense multiple of 128.  Padding is exact: ReLU(0)=0 and the padded W2
    rows are zero, so padded hidden columns contribute nothing.
    """
    hidden = w1.shape[1]
    hid_pad = _round_up(hidden, LANE)
    pad_h = hid_pad - hidden
    w1y = jnp.pad(w1[:rep_dim], ((0, 0), (0, pad_h))).astype(jnp.float32)
    w1s = jnp.pad(w1[rep_dim:], ((0, 0), (0, pad_h))).astype(jnp.float32)
    b1p = jnp.pad(b1, (0, pad_h)).reshape(1, hid_pad).astype(jnp.float32)
    w2p = jnp.pad(w2, ((0, pad_h), (0, 0))).astype(jnp.float32)
    b2p = b2.reshape(1, -1).astype(jnp.float32)
    return w1y, w1s, b1p, w2p, b2p


def _pick_batch_tile(B):
    # Big tiles (amortize per-step overhead) but keep >= MIN_GRID_STEPS steps
    # so v7x's two TensorCores both get work; always a multiple of 8 (sublane).
    tb = _round_up(-(-B // MIN_GRID_STEPS), 8)
    return int(max(8, min(TB_MAX, tb)))


def decoder_vector(y, s, params, *, s_dim, force_pallas=False):
    """Forward of DecoderVector.

    y      : (B, rep_dim)                      float32
    s      : any shape reshapeable to (B, s_dim)  (== s.view(-1, s_dim))
    params : output of prepare_decoder_params
    returns (B, out_dim) float32
    """
    w1y, w1s, b1p, w2p, b2p = params
    rep_dim = y.shape[1]
    hid_pad = w2p.shape[0]
    out_dim = w2p.shape[1]
    s2 = s.reshape(-1, s_dim)
    B = y.shape[0]
    assert s2.shape[0] == B

    if B < SMALL_BATCH_FALLBACK and not force_pallas:
        # Tiny batches: pallas_call fixed cost dwarfs the ~kFLOPs of work.
        h = jnp.maximum(y @ w1y + s2 @ w1s + b1p, 0.0)
        return h @ w2p + b2p

    TB = _pick_batch_tile(B)
    grid = (pl.cdiv(B, TB),)   # ragged last block handled by Pallas masking

    flops = 2 * B * ((rep_dim + s_dim) * hid_pad + hid_pad * out_dim)
    bytes_accessed = (y.size * 4 + s2.size * 4 + w1y.size * 4 + w1s.size * 4 +
                      b1p.size * 4 + w2p.size * 4 + b2p.size * 4 + B * out_dim * 4)

    return pl.pallas_call(
        _decoder_vector_kernel,
        out_shape=jax.ShapeDtypeStruct((B, out_dim), jnp.float32),
        grid=grid,
        in_specs=[
            pl.BlockSpec((TB, rep_dim), lambda i: (i, 0)),       # y   (batch-tiled)
            pl.BlockSpec((TB, s_dim), lambda i: (i, 0)),         # s   (batch-tiled)
            pl.BlockSpec((rep_dim, hid_pad), lambda i: (0, 0)),  # W1y (VMEM-resident)
            pl.BlockSpec((s_dim, hid_pad), lambda i: (0, 0)),    # W1s (VMEM-resident)
            pl.BlockSpec((1, hid_pad), lambda i: (0, 0)),        # b1  (VMEM-resident)
            pl.BlockSpec((hid_pad, out_dim), lambda i: (0, 0)),  # W2  (VMEM-resident)
            pl.BlockSpec((1, out_dim), lambda i: (0, 0)),        # b2  (VMEM-resident)
        ],
        out_specs=pl.BlockSpec((TB, out_dim), lambda i: (i, 0)),   # unpadded writeback
        compiler_params=pltpu.CompilerParams(
            dimension_semantics=("parallel",),
            vmem_limit_bytes=32 * 1024 * 1024),
        cost_estimate=pl.CostEstimate(
            flops=flops, transcendentals=0, bytes_accessed=bytes_accessed),
    )(y, s2, w1y, w1s, b1p, w2p, b2p)


def init_params(key, representation_dim, s_dim, output_dim, hidden=100):
    """Deterministic init mimicking PyTorch nn.Linear default U(-1/sqrt(fan_in), ...)."""
    k1, k2, k3, k4 = jax.random.split(key, 4)
    in1 = representation_dim + s_dim
    bound1 = 1.0 / jnp.sqrt(jnp.float32(in1))
    bound2 = 1.0 / jnp.sqrt(jnp.float32(hidden))
    w1 = jax.random.uniform(k1, (in1, hidden), jnp.float32, -bound1, bound1)
    b1 = jax.random.uniform(k2, (hidden,), jnp.float32, -bound1, bound1)
    w2 = jax.random.uniform(k3, (hidden, output_dim), jnp.float32, -bound2, bound2)
    b2 = jax.random.uniform(k4, (output_dim,), jnp.float32, -bound2, bound2)
    return w1, b1, w2, b2


if __name__ == "__main__":
    key = jax.random.PRNGKey(0)
    k_y, k_s, k_p, k_y2, k_s2 = jax.random.split(key, 5)

    representation_dim = 16
    s_dim = 8
    output_dim = 12

    w1, b1, w2, b2 = init_params(k_p, representation_dim, s_dim, output_dim)
    params = prepare_decoder_params(w1, b1, w2, b2, rep_dim=representation_dim)

    def reference(y, s):
        x = jnp.concatenate([y, s.reshape(-1, s_dim)], axis=1)
        return jnp.maximum(x @ w1 + b1, 0.0) @ w2 + b2

    # Case 1: tiny batch (module-sized demo), force the Pallas kernel path.
    batch = 8
    y0 = jax.random.normal(k_y, (batch, representation_dim), jnp.float32)
    s0 = jax.random.normal(k_s, (batch, 2, 4), jnp.float32)  # viewed to (-1, s_dim)
    out0 = jax.block_until_ready(
        decoder_vector(y0, s0, params, s_dim=s_dim, force_pallas=True))
    ref0 = reference(y0, s0)
    assert out0.shape == (batch, output_dim)
    assert jnp.allclose(out0, ref0, atol=5e-2, rtol=5e-2), \
        float(jnp.max(jnp.abs(out0 - ref0)))

    # Case 2: larger batch -> default Pallas path with a multi-step "parallel"
    # grid and a ragged last block (3000 is not a multiple of the batch tile).
    B1 = 3000
    y1 = jax.random.normal(k_y2, (B1, representation_dim), jnp.float32)
    s1 = jax.random.normal(k_s2, (B1, s_dim), jnp.float32)
    out1 = jax.block_until_ready(decoder_vector(y1, s1, params, s_dim=s_dim))
    ref1 = reference(y1, s1)
    assert out1.shape == (B1, output_dim)
    assert jnp.allclose(out1, ref1, atol=5e-2, rtol=5e-2), \
        float(jnp.max(jnp.abs(out1 - ref1)))

    # Case 3: small-batch XLA fast path (same math; padded columns are zero).
    out2 = jax.block_until_ready(decoder_vector(y0, s0, params, s_dim=s_dim))
    assert jnp.allclose(out2, ref0, atol=5e-2, rtol=5e-2)

    print("KERNEL_OK")
</pallas_src>

<mosaic_0001>
module attributes {stable_mosaic.version = 11 : i64} {
  func.func @_decoder_vector_kernel(%arg0: i32, %arg1: memref<8x16xf32, #tpu.memory_space<vmem>>, %arg2: memref<8x8xf32, #tpu.memory_space<vmem>>, %arg3: memref<16x128xf32, #tpu.memory_space<vmem>>, %arg4: memref<8x128xf32, #tpu.memory_space<vmem>>, %arg5: memref<1x128xf32, #tpu.memory_space<vmem>>, %arg6: memref<128x12xf32, #tpu.memory_space<vmem>>, %arg7: memref<1x12xf32, #tpu.memory_space<vmem>>, %arg8: memref<8x12xf32, #tpu.memory_space<vmem>>) attributes {dimension_semantics = [#tpu.dimension_semantics<parallel>], iteration_bounds = array<i64: 1>, scalar_prefetch = 0 : i64, scratch_operands = 0 : i64, tpu.core_type = #tpu.core_type<tc>, window_params = [{transform_indices = @transform_0, window_bounds = array<i64: 8, 16>}, {transform_indices = @transform_1, window_bounds = array<i64: 8, 8>}, {pipeline_mode = #tpu.pipeline_mode<synchronous>, transform_indices = @transform_2, window_bounds = array<i64: 16, 128>}, {pipeline_mode = #tpu.pipeline_mode<synchronous>, transform_indices = @transform_3, window_bounds = array<i64: 8, 128>}, {pipeline_mode = #tpu.pipeline_mode<synchronous>, transform_indices = @transform_4, window_bounds = array<i64: 1, 128>}, {pipeline_mode = #tpu.pipeline_mode<synchronous>, transform_indices = @transform_5, window_bounds = array<i64: 128, 12>}, {pipeline_mode = #tpu.pipeline_mode<synchronous>, transform_indices = @transform_6, window_bounds = array<i64: 1, 12>}, {transform_indices = @transform_7, window_bounds = array<i64: 8, 12>}]} {
    %c0 = arith.constant 0 : index
    %c0_0 = arith.constant 0 : index
    %0 = vector.load %arg1[%c0, %c0_0] : memref<8x16xf32, #tpu.memory_space<vmem>>, vector<8x16xf32>
    %c0_1 = arith.constant 0 : index
    %c0_2 = arith.constant 0 : index
    %1 = vector.load %arg3[%c0_1, %c0_2] : memref<16x128xf32, #tpu.memory_space<vmem>>, vector<16x128xf32>
    %cst = arith.constant dense<0.000000e+00> : vector<8x128xf32>
    %2 = tpu.matmul %0, %1, %cst {dimension_numbers = #tpu.dot_dimension_numbers<[1], [0], [0], [1], [0, 0, 1, 1], [], []>} : vector<8x16xf32>, vector<16x128xf32>, vector<8x128xf32> -> vector<8x128xf32>
    %c0_3 = arith.constant 0 : index
    %c0_4 = arith.constant 0 : index
    %3 = vector.load %arg2[%c0_3, %c0_4] : memref<8x8xf32, #tpu.memory_space<vmem>>, vector<8x8xf32>
    %c0_5 = arith.constant 0 : index
    %c0_6 = arith.constant 0 : index
    %4 = vector.load %arg4[%c0_5, %c0_6] : memref<8x128xf32, #tpu.memory_space<vmem>>, vector<8x128xf32>
    %cst_7 = arith.constant dense<0.000000e+00> : vector<8x128xf32>
    %5 = tpu.matmul %3, %4, %cst_7 {dimension_numbers = #tpu.dot_dimension_numbers<[1], [0], [0], [1], [0, 0, 1, 1], [], []>} : vector<8x8xf32>, vector<8x128xf32>, vector<8x128xf32> -> vector<8x128xf32>
    %6 = arith.addf %2, %5 : vector<8x128xf32>
    %c0_8 = arith.constant 0 : index
    %c0_9 = arith.constant 0 : index
    %7 = vector.load %arg5[%c0_8, %c0_9] : memref<1x128xf32, #tpu.memory_space<vmem>>, vector<1x128xf32>
    %8 = vector.broadcast %7 : vector<1x128xf32> to vector<8x128xf32>
    %9 = arith.addf %6, %8 : vector<8x128xf32>
    %cst_10 = arith.constant 0.000000e+00 : f32
    %10 = vector.broadcast %cst_10 : f32 to vector<8x128xf32>
    %11 = arith.maximumf %9, %10 : vector<8x128xf32>
    %c0_11 = arith.constant 0 : index
    %c0_12 = arith.constant 0 : index
    %12 = vector.load %arg6[%c0_11, %c0_12] : memref<128x12xf32, #tpu.memory_space<vmem>>, vector<128x12xf32>
    %cst_13 = arith.constant dense<0.000000e+00> : vector<8x12xf32>
    %13 = tpu.matmul %11, %12, %cst_13 {dimension_numbers = #tpu.dot_dimension_numbers<[1], [0], [0], [1], [0, 0, 1, 1], [], []>} : vector<8x128xf32>, vector<128x12xf32>, vector<8x12xf32> -> vector<8x12xf32>
    %c0_14 = arith.constant 0 : index
    %c0_15 = arith.constant 0 : index
    %14 = vector.load %arg7[%c0_14, %c0_15] : memref<1x12xf32, #tpu.memory_space<vmem>>, vector<1x12xf32>
    %15 = vector.broadcast %14 : vector<1x12xf32> to vector<8x12xf32>
    %16 = arith.addf %13, %15 : vector<8x12xf32>
    %c0_16 = arith.constant 0 : index
    %c0_17 = arith.constant 0 : index
    %17 = vector.load %arg8[%c0_16, %c0_17] : memref<8x12xf32, #tpu.memory_space<vmem>>, vector<8x12xf32>
    tpu.vector_store %arg8[%c0_16, %c0_17], %16 {strides = array<i32>} : memref<8x12xf32, #tpu.memory_space<vmem>>, vector<8x12xf32>,
    return
  }
  func.func @transform_0(%arg0: i32) -> (i32, i32) {
    %c0_i32 = arith.constant 0 : i32
    %c0_i32_0 = arith.constant 0 : i32
    return %arg0, %c0_i32 : i32, i32
  }
  func.func @transform_1(%arg0: i32) -> (i32, i32) {
    %c0_i32 = arith.constant 0 : i32
    %c0_i32_0 = arith.constant 0 : i32
    return %arg0, %c0_i32 : i32, i32
  }
  func.func @transform_2(%arg0: i32) -> (i32, i32) {
    %c0_i32 = arith.constant 0 : i32
    %c0_i32_0 = arith.constant 0 : i32
    %c0_i32_1 = arith.constant 0 : i32
    return %c0_i32, %c0_i32_0 : i32, i32
  }
  func.func @transform_3(%arg0: i32) -> (i32, i32) {
    %c0_i32 = arith.constant 0 : i32
    %c0_i32_0 = arith.constant 0 : i32
    %c0_i32_1 = arith.constant 0 : i32
    return %c0_i32, %c0_i32_0 : i32, i32
  }
  func.func @transform_4(%arg0: i32) -> (i32, i32) {
    %c0_i32 = arith.constant 0 : i32
    %c0_i32_0 = arith.constant 0 : i32
    %c0_i32_1 = arith.constant 0 : i32
    return %c0_i32, %c0_i32_0 : i32, i32
  }
  func.func @transform_5(%arg0: i32) -> (i32, i32) {
    %c0_i32 = arith.constant 0 : i32
    %c0_i32_0 = arith.constant 0 : i32
    %c0_i32_1 = arith.constant 0 : i32
    return %c0_i32, %c0_i32_0 : i32, i32
  }
  func.func @transform_6(%arg0: i32) -> (i32, i32) {
    %c0_i32 = arith.constant 0 : i32
    %c0_i32_0 = arith.constant 0 : i32
    %c0_i32_1 = arith.constant 0 : i32
    return %c0_i32, %c0_i32_0 : i32, i32
  }
  func.func @transform_7(%arg0: i32) -> (i32, i32) {
    %c0_i32 = arith.constant 0 : i32
    %c0_i32_0 = arith.constant 0 : i32
    return %arg0, %c0_i32 : i32, i32
  }
}

</mosaic_0001>

<bundles_post_ra>
// kernel: tpu_custom_call.1
= control target key start
LH: loop header
LB: loop body
LE: loop exit
PB: predicated region body
PF: predicated region fallthrough
CT: control target
= control target key end

     0   :  { %vm32_vm0 = vcmask 64512   ;;  %v426_v2 = vmov 0.0   ;;  %vm427_vm1 = vmmov 0   ;;  %v428_v6 = vmov 0.0|0.0   ;;  %s554_s0 = inlined_call_operand.vmem [shape: f32[8,16], index: 0, kind: input, shape index: {}]   ;;  %s555_s1 = inlined_call_operand.vmem [shape: f32[8,8], index: 1, kind: input, shape index: {}]   ;;  %s556_s2 = inlined_call_operand.vmem [shape: f32[16,128], index: 2, kind: input, shape index: {}]   ;;  %s557_s3 = inlined_call_operand.vmem [shape: f32[8,128], index: 3, kind: input, shape index: {}]   ;;  %s558_s4 = inlined_call_operand.vmem [shape: f32[1,128], index: 4, kind: input, shape index: {}]   ;;  %s559_s5 = inlined_call_operand.vmem [shape: f32[128,12], index: 5, kind: input, shape index: {}]   ;;  %s560_s6 = inlined_call_operand.vmem [shape: f32[1,12], index: 6, kind: input, shape index: {}]   ;;  %s561_s7 = inlined_call_operand.hbm [shape: f32[8,12], index: 7, kind: output, shape index: {}]  }
   0x1   :  { %v31_v0 = vld [vmem:[%s557_s3] sm:$0xff]  ;;  %324 = vmatprep.subr.mxu1 %v426_v2  ;;  %326 = vmatprep.mubr.msk.f32.mxu1 %vm427_vm1, %v426_v2  ;;  %v29_v4 = vld [vmem:[%s556_s2 + $0x8] sm:$0xff]  ;;  %v191_v9 = vld [vmem:[%s559_s5 + $0x10] sm:$0xff]  ;;  %vm106_vm2 = vcmask 130048  }
   0x2   :  { %v30_v1 = vld [vmem:[%s555_s1] sm:$0xff]  ;;  %325 = vmatpush3.msra.mxu1 %v31_v0  ;;  %374 = vmatprep.subr.bf16.mxu0 %v428_v6  ;;  %v190_v8 = vld [vmem:[%s559_s5 + $0x8] sm:$0xff]  ;;  %v192_v11 = vld [vmem:[%s559_s5 + $0x18] sm:$0xff] }
   0x3   :  { %v28_v3 = vld [vmem:[%s556_s2] sm:$0xff]  ;;  %327 = vmatmul.mubr.msk.f32.vlgmr.msra.gmra.mrb[0].mxu1 %vm32_vm0, %v30_v1  ;;  %371 = vmatprep.subr.bf16.mxu1 %v428_v6  ;;  %v378_v13 = vpack.c.bf16 %v192_v11, %v191_v9 }
   0x4   :  { %v372_v5 = vpack.c.bf16 %v29_v4, %v28_v3  ;;  %v189_v7 = vld [vmem:[%s559_s5] sm:$0xff]  ;;  %333 = vmatprep.mubr.msk.f32.mxu1 %vm427_vm1, %v426_v2  ;;  %368 = vmatprep.mubr.msk.f32.mxu0 %vm427_vm1, %v426_v2 }
   0x5   :  { %v375_v10 = vpack.c.bf16 %v190_v8, %v189_v7  ;;  %v27_v12 = vld [vmem:[%s554_s0] sm:$0xff] }
   0x6   :  { %373 = vmatpush3.bf16.msra.mxu1 %v372_v5 }
   0x7   :  { %376 = vmatpush3.bf16.msra.mxu0 %v375_v10 }
   0x8   :  { %12 = vsyncpa [#allocation3], 0  ;;  %377 = vmatprep.subr.bf16.mxu0 %v428_v6  ;;  %v193_v14 = vld [vmem:[%s559_s5 + $0x20] sm:$0xff]  ;;  %v194_v15 = vld [vmem:[%s559_s5 + $0x28] sm:$0xff]  ;;  %s429_s17 = smov [#allocation2]   ;;  %vm282_vm3 = vcmask 97280  }
   0x9   :  { %334 = vmatmul.mubr.msk.f32.vlgmr.msra.gmra.mrb[2].mxu1 %vm106_vm2, %v27_v12  ;;  %v381_v16 = vpack.c.bf16 %v194_v15, %v193_v14  ;;  %v195_v17 = vld [vmem:[%s559_s5 + $0x30] sm:$0xff]  ;;  %v196_v18 = vld [vmem:[%s559_s5 + $0x38] sm:$0xff]  ;;  %v197_v20 = vld [vmem:[%s559_s5 + $0x40] sm:$0xff] }
   0xa   :  { %v384_v19 = vpack.c.bf16 %v196_v18, %v195_v17  ;;  %v198_v21 = vld [vmem:[%s559_s5 + $0x48] sm:$0xff]  ;;  %v199_v23 = vld [vmem:[%s559_s5 + $0x50] sm:$0xff]  ;;  %v200_v24 = vld [vmem:[%s559_s5 + $0x58] sm:$0xff] }
   0xb   :  { %379 = vmatpush3.bf16.msra.mxu0 %v378_v13  ;;  %v387_v22 = vpack.c.bf16 %v198_v21, %v197_v20  ;;  %v390_v25 = vpack.c.bf16 %v200_v24, %v199_v23  ;;  %v201_v26 = vld [vmem:[%s559_s5 + $0x60] sm:$0xff]  ;;  %v202_v27 = vld [vmem:[%s559_s5 + $0x68] sm:$0xff]  ;;  %v203_v29 = vld [vmem:[%s559_s5 + $0x70] sm:$0xff] }
   0xc   :  { %380 = vmatprep.subr.bf16.mxu0 %v428_v6  ;;  %v393_v28 = vpack.c.bf16 %v202_v27, %v201_v26  ;;  %v204_v30 = vld [vmem:[%s559_s5 + $0x78] sm:$0xff]  ;;  %v300_v35 = vld [vmem:[%s558_s4] ss:$0 sm:$0xff]  ;;  %s290_s5 = sshll.u32 %s429_s17, 4  ;;  %s291_s5 = int_to_ptr.vmem [resolvable:$true] %s290_s5 }
   0xd   :  { %v396_v31 = vpack.c.bf16 %v204_v30, %v203_v29  ;;  %v301_v40 = vld [vmem:[%s560_s6] ss:$0 sm:$0xff]  ;;  %s402_s18 = scalar_lea.vmem %s291_s5, 128  ;;  %p407_p1 = scmp.lt.s32.totalorder %s291_s5, %s291_s5 }
   0xe   :  { %p403_p0 = scmp.ne.s32.totalorder %s291_s5, %s402_s18  ;;  %p408_p2 = scmp.lt.s32.totalorder %s402_s18, %s402_s18 }
   0xf   :  { %382 = vmatpush3.bf16.msra.mxu0 %v381_v16 }
  0x10   :  { %383 = vmatprep.subr.bf16.mxu0 %v428_v6  ;;  %p409_p3 = por %p408_p2, %p407_p1 }
  0x12   :  { %p410_p4 = pnand %p409_p3, %p403_p0 }
  0x13   :  { %385 = vmatpush3.bf16.msra.mxu0 %v384_v19 }
  0x14   :  { %386 = vmatprep.subr.bf16.mxu0 %v428_v6 }
  0x17   :  { %388 = vmatpush3.bf16.msra.mxu0 %v387_v22 }
  0x18   :  { %389 = vmatprep.subr.bf16.mxu0 %v428_v6 }
  0x1b   :  { %391 = vmatpush3.bf16.msra.mxu0 %v390_v25 }
  0x1c   :  { %392 = vmatprep.subr.bf16.mxu0 %v428_v6 }
  0x1f   :  { %394 = vmatpush3.bf16.msra.mxu0 %v393_v28 }
  0x20   :  { %395 = vmatprep.subr.bf16.mxu0 %v428_v6 }
  0x23   :  { %397 = vmatpush3.bf16.msra.mxu0 %v396_v31 }
  0xd6   :  { %v102_v32 = vpop.f32.mrb[0].mxu1 }
  0xd7   :  { %v328_v33 = vpop.f32.mrb[1].mxu1 }
  0xdc   :  { %v176_v34 = vpop.f32.mrb[2].mxu1 }
  0xdd   :  { %v177_v36 = vadd.f32 %v176_v34, %v102_v32  ;;  %v335_v37 = vpop.f32.mrb[3].mxu1 }
  0xdf   :  { %v187_v38 = vadd.f32 %v300_v35, %v177_v36 }
  0xe1   :  { %v188_v39 = vmax.f32 %v187_v38, 0.0 }
  0xe3   :  { %369 = vmatmul.mubr.f32.vlgmr.msra.gmra.mrb[0].mxu0 %v188_v39 }
 0x1b6   :  { %v278_v41 = vpop.f32.mrb[0].mxu0 }
 0x1b7   :  { %v279_v42 = vadd.f32 %v301_v40, %v278_v41  ;;  %v370_v43 = vpop.f32.mrb[1].mxu0 }
 0x1b9   :  { %283 = vst.msk [vmem:[#allocation2] sm:$0xff] %vm282_vm3, %v279_v42 }
 0x1ba   :  { %413 = shalt.err (!%p410_p4)
}
 0x1bb   :  { %s414_s0 = scalar_lea.hbm %s561_s7, 128 }
 0x1bc   :  { %p415_p5 = scmp.ne.s32.totalorder %s561_s7, %s414_s0  ;;  %p418_p6 = scmp.lt.u32.totalorder %s414_s0, %s561_s7 }
 0x1be   :  { %p420_p7 = pnand %p418_p6, %p415_p5 }
 0x1c0   :  { %423 = shalt.err (!%p420_p7)
}
 0x1c1   :  { %293 = dma.vmem_to_hbm [thread:$0]  %s291_s5, 128, %s561_s7, [#allocation3]  }
 0x1c2   :  { %424 = dma.done.wait [#allocation3], 128  }
 0x1c3   :  { %425 = vsyncadd [#allocation3], 4294967168 }
 0x1c4   :  { %297 = vsyncpa [#allocation3], 1 }

</bundles_post_ra>
